<compile_context>
chip_gen: v7x
topology: tpu7x:2x2x1
jax: 0.10.0
libtpu: 0.0.40
codegen_flags: <defaults>
</compile_context>

<pallas_src>
import functools

import jax
import jax.numpy as jnp
from jax import lax
from jax.experimental import pallas as pl
from jax.experimental.pallas import tpu as pltpu

LANE = 128  # lane-dense head-slab width


def depprobe_mix_kernel(sm_arc_ref, sm_lbl_ref, mask_ref, layer_ref, w_ref,
                        head_ref, dist_ref, acc_ref, *, d, nl):
    l = pl.program_id(1)
    num_l = pl.num_programs(1)
    b_blk, t, lane = acc_ref.shape
    e = layer_ref.shape[-1]

    # --- project this layer on the MXU (bf16 inputs, f32 accumulation) ---
    x = layer_ref[...].reshape(b_blk * t, e)                       # bf16
    y = jnp.dot(x, w_ref[...],
                preferred_element_type=jnp.float32)                # (B*T, 128) f32
    y = y.reshape(b_blk, t, lane)

    # Per-lane softmax mix weight for this layer, applied in f32 post-matmul:
    # arc weight on dep lanes [0, D), label weight on [D, D+NL), 0 on pad.
    lane_idx = lax.broadcasted_iota(jnp.int32, (1, 1, lane), 2)
    wa = sm_arc_ref[l]
    wl = sm_lbl_ref[l]
    scale = jnp.where(lane_idx < d, wa,
                      jnp.where(lane_idx < d + nl, wl, 0.0))       # (1,1,128) f32

    @pl.when(l == 0)
    def _():
        acc_ref[...] = y * scale

    @pl.when(l > 0)
    def _():
        acc_ref[...] = acc_ref[...] + y * scale

    # --- finalize once all layers have been mixed ---
    @pl.when(l == num_l - 1)
    def _():
        acc = acc_ref[...]                                         # (B_blk, T, 128)

        # Pairwise squared-L2 distances of the dep embeddings via the Gram
        # identity |a|^2 + |b|^2 - 2 a.b.  Zero the non-dep lanes so the full
        # 128-lane slab can be contracted directly on the MXU (no narrow
        # sub-tile slice).  NOTE: like any Gram formulation this can lose
        # precision for near-duplicate embeddings; clamped at 0.
        dep_full = jnp.where(lane_idx < d, acc, 0.0)               # (B_blk, T, 128)
        sq = jnp.sum(dep_full * dep_full, axis=-1)                 # (B_blk, T)
        gram = lax.dot_general(
            dep_full, dep_full,
            dimension_numbers=(((2,), (2,)), ((0,), (0,))),
            preferred_element_type=jnp.float32)                    # (B_blk, T, T)
        dist_ref[...] = jnp.maximum(
            sq[:, :, None] + sq[:, None, :] - 2.0 * gram, 0.0)

        # Head slab [dep | logits | 0]: only the logit lanes of padded tokens
        # get -inf (matches LabelClassifier's -inf init + masked assign);
        # dep and pad lanes pass through untouched.
        is_lbl_lane = (lane_idx >= d) & (lane_idx < d + nl)
        keep = (mask_ref[...][:, :, None] > 0.5) | jnp.logical_not(is_lbl_lane)
        head_ref[...] = jnp.where(keep, acc, -jnp.inf)


def _vmem_capacity_bytes():
    try:
        info = pltpu.get_tpu_info()
        cap = getattr(info, "vmem_capacity_bytes", None)
        if cap:
            return int(cap)
    except Exception:
        pass
    return 64 * 1024 * 1024     # conservative (v7x-sized) fallback


def depprobe_mix_forward(emb_layers, att_mask, mix_arc, mix_lbl,
                         w_arc_t, w_lbl_t, *, block_b=None):
    """emb_layers: (L, B, T, E); att_mask: (B, T) bool; mix_arc/mix_lbl: (L,);
       w_arc_t: (E, D); w_lbl_t: (E, NL) (nn.Linear weights pre-transposed).
       Returns the decode=False outputs of DepProbeMix.forward."""
    L, B, T, E = emb_layers.shape
    D = w_arc_t.shape[1]
    NL = w_lbl_t.shape[1]
    assert D + NL <= LANE

    # Pad T to a sublane multiple so layer loads / dist stores stay aligned.
    T_pad = ((T + 7) // 8) * 8

    # --- VMEM-aware tile sizing (v5e/v6e: 128 MiB physical, v7x: 64 MiB) ---
    vmem_cap = _vmem_capacity_bytes()
    vmem_limit = max(32 * 1024 * 1024, int(vmem_cap * 0.8))
    budget = int(vmem_limit * 0.7)          # headroom for compiler internals

    def _block_bytes(bb):
        layer = 2 * bb * T_pad * E * 2      # double-buffered bf16 layer tile
        acc = bb * T_pad * LANE * 4         # f32 mix accumulator (scratch)
        head = 2 * bb * T_pad * LANE * 4    # double-buffered head slab
        dist = 2 * bb * T_pad * T_pad * 4   # double-buffered distances
        mask = 2 * bb * T_pad * 4
        w = 2 * E * LANE * 2
        return layer + acc + head + dist + mask + w

    if block_b is None:
        # Valid block sizes: B itself, or a divisor of B that is a multiple of
        # 8 (keeps every BlockSpec dim either full-extent or 8/128-aligned).
        cands = [d for d in range(B, 0, -1)
                 if B % d == 0 and (d == B or d % 8 == 0)]
        block_b = next((d for d in cands if _block_bytes(d) <= budget), cands[-1])
        # TODO(synk): on v7x (2 TensorCores) prefer a block_b giving nb >= 2 so
        # the "parallel" batch axis actually shards across both cores.
    assert B % block_b == 0
    nb = B // block_b

    # --- glue done outside the kernel ---
    sm_arc = jax.nn.softmax(mix_arc.astype(jnp.float32))
    sm_lbl = jax.nn.softmax(mix_lbl.astype(jnp.float32))
    # One fused, pre-padded projection weight [W_arc | W_lbl | 0]: its matmul
    # output is directly the lane-dense head slab.
    w_fused = jnp.zeros((E, LANE), jnp.float32)
    w_fused = w_fused.at[:, :D].set(w_arc_t.astype(jnp.float32))
    w_fused = w_fused.at[:, D:D + NL].set(w_lbl_t.astype(jnp.float32))
    w_fused = w_fused.astype(jnp.bfloat16)
    # Stream the LM layers as bf16 (halves HBM traffic; f32 accum in-kernel).
    x_bf = emb_layers.astype(jnp.bfloat16)
    mask_f = att_mask.astype(jnp.float32)
    if T_pad != T:
        x_bf = jnp.pad(x_bf, ((0, 0), (0, 0), (0, T_pad - T), (0, 0)))
        mask_f = jnp.pad(mask_f, ((0, 0), (0, T_pad - T)))

    kernel = functools.partial(depprobe_mix_kernel, d=D, nl=NL)

    grid_spec = pltpu.PrefetchScalarGridSpec(
        num_scalar_prefetch=0,
        grid=(nb, L),                                        # L = reduction axis (last)
        in_specs=[
            pl.BlockSpec(memory_space=pltpu.MemorySpace.SMEM),    # sm_arc (L,)
            pl.BlockSpec(memory_space=pltpu.MemorySpace.SMEM),    # sm_lbl (L,)
            pl.BlockSpec((block_b, T_pad), lambda b, l: (b, 0)),  # mask
            pl.BlockSpec((None, block_b, T_pad, E),               # one bf16 layer/step
                         lambda b, l: (l, b, 0, 0)),
            pl.BlockSpec((E, LANE), lambda b, l: (0, 0)),         # fused bf16 weight
        ],
        out_specs=[
            pl.BlockSpec((block_b, T_pad, LANE), lambda b, l: (b, 0, 0)),   # head slab
            pl.BlockSpec((block_b, T_pad, T_pad), lambda b, l: (b, 0, 0)),  # distances
        ],
        scratch_shapes=[
            pltpu.VMEM((block_b, T_pad, LANE), jnp.float32),      # mix accumulator
        ],
    )
    out_shapes = (
        jax.ShapeDtypeStruct((B, T_pad, LANE), jnp.float32),
        jax.ShapeDtypeStruct((B, T_pad, T_pad), jnp.float32),
    )
    head, dist = pl.pallas_call(
        kernel,
        out_shape=out_shapes,
        grid_spec=grid_spec,
        compiler_params=pltpu.CompilerParams(
            dimension_semantics=("parallel", "arbitrary"),
            vmem_limit_bytes=vmem_limit,
        ),
    )(sm_arc, sm_lbl, mask_f, x_bf, w_fused)

    return {
        "dependency_embeddings": head[:, :T, :D],
        "distances": dist[:, :T, :T],
        "label_logits": head[:, :T, D:D + NL],
    }


def depprobe_mix_reference(emb_layers, att_mask, mix_arc, mix_lbl,
                           w_arc_t, w_lbl_t, *, kernel_numerics=True):
    """Plain-JAX reference mirroring the PyTorch forward (decode=False).
    kernel_numerics=True mirrors the kernel's per-layer bf16 MXU matmuls with
    f32 mix-weight accumulation; False is the pure-f32 PyTorch semantics."""
    sm_arc = jax.nn.softmax(mix_arc.astype(jnp.float32))
    sm_lbl = jax.nn.softmax(mix_lbl.astype(jnp.float32))
    if kernel_numerics:
        x_bf = emb_layers.astype(jnp.bfloat16)
        pa = jnp.einsum("lbte,ed->lbtd", x_bf, w_arc_t.astype(jnp.bfloat16),
                        preferred_element_type=jnp.float32)
        pb = jnp.einsum("lbte,en->lbtn", x_bf, w_lbl_t.astype(jnp.bfloat16),
                        preferred_element_type=jnp.float32)
        dep = jnp.einsum("l,lbtd->btd", sm_arc, pa)
        lbl = jnp.einsum("l,lbtn->btn", sm_lbl, pb)
    else:
        emb_arc = jnp.einsum("l,lbte->bte", sm_arc, emb_layers)
        emb_lbl = jnp.einsum("l,lbte->bte", sm_lbl, emb_layers)
        dep = emb_arc @ w_arc_t
        lbl = emb_lbl @ w_lbl_t
    diffs = dep[:, :, None, :] - dep[:, None, :, :]
    dist = jnp.sum(diffs ** 2, axis=-1)
    logits = jnp.where(att_mask[:, :, None], lbl, -jnp.inf)
    return dep, dist, logits


def _check_logits(got, want, atol, rtol):
    finite = jnp.isfinite(want)
    assert jnp.array_equal(finite, jnp.isfinite(got)), "-inf pattern mismatch"
    assert jnp.allclose(jnp.where(finite, got, 0.0),
                        jnp.where(finite, want, 0.0), atol=atol, rtol=rtol)


if __name__ == "__main__":
    # Small shapes consistent with the module's forward.
    L, B, T, E = 4, 2, 8, 32       # lm layers, batch, max tokens, embedding dim
    D = 16                         # dep_dim
    DEP_RELS = ["det", "nsubj", "root", "obj", "amod", "advmod", "case", "punct"]
    NL = len(DEP_RELS)             # num labels (root index only used when decoding)

    key = jax.random.PRNGKey(0)
    k_emb, k_arc, k_lbl, k_mixa, k_mixl = jax.random.split(key, 5)

    emb_layers = jax.random.normal(k_emb, (L, B, T, E), dtype=jnp.float32)
    # attention mask: sentence 0 has 8 tokens, sentence 1 has 5 tokens.
    lengths = jnp.array([8, 5])
    att_mask = jnp.arange(T)[None, :] < lengths[:, None]     # (B, T) bool

    # torch stores Linear weight as (out, in); we keep the transposed (in, out).
    w_arc_t = jax.random.normal(k_arc, (E, D), dtype=jnp.float32) * 0.1
    w_lbl_t = jax.random.normal(k_lbl, (E, NL), dtype=jnp.float32) * 0.1
    mix_arc = jnp.ones((L,), jnp.float32) + 0.1 * jax.random.normal(k_mixa, (L,))
    mix_lbl = jnp.ones((L,), jnp.float32) + 0.1 * jax.random.normal(k_mixl, (L,))

    results = depprobe_mix_forward(emb_layers, att_mask, mix_arc, mix_lbl,
                                   w_arc_t, w_lbl_t)
    jax.block_until_ready(results)

    # Strict check against a reference mirroring the kernel's bf16-per-layer
    # MXU numerics (f32 mix accumulation).
    dep_r, dist_r, log_r = depprobe_mix_reference(
        emb_layers, att_mask, mix_arc, mix_lbl, w_arc_t, w_lbl_t,
        kernel_numerics=True)
    assert jnp.allclose(results["dependency_embeddings"], dep_r, atol=1e-3, rtol=1e-3)
    assert jnp.allclose(results["distances"], dist_r, atol=1e-3, rtol=1e-3)
    _check_logits(results["label_logits"], log_r, atol=1e-3, rtol=1e-3)

    # Loose semantic check against the pure-f32 PyTorch-equivalent reference
    # (bf16 layer streaming introduces small, bounded rounding differences).
    dep_f, dist_f, log_f = depprobe_mix_reference(
        emb_layers, att_mask, mix_arc, mix_lbl, w_arc_t, w_lbl_t,
        kernel_numerics=False)
    assert jnp.allclose(results["dependency_embeddings"], dep_f, atol=5e-2, rtol=5e-2)
    assert jnp.allclose(results["distances"], dist_f, atol=5e-2, rtol=5e-2)
    _check_logits(results["label_logits"], log_f, atol=5e-2, rtol=5e-2)

    print("KERNEL_OK")
</pallas_src>

<mosaic_0001>
module attributes {stable_mosaic.version = 11 : i64} {
  func.func @depprobe_mix_kernel(%arg0: i32, %arg1: i32, %arg2: memref<4xf32, #tpu.memory_space<smem>>, %arg3: memref<4xf32, #tpu.memory_space<smem>>, %arg4: memref<2x8xf32, #tpu.memory_space<vmem>>, %arg5: memref<1x2x8x32xbf16, #tpu.memory_space<vmem>>, %arg6: memref<32x128xbf16, #tpu.memory_space<vmem>>, %arg7: memref<2x8x128xf32, #tpu.memory_space<vmem>>, %arg8: memref<2x8x8xf32, #tpu.memory_space<vmem>>, %arg9: memref<2x8x128xf32, #tpu.memory_space<vmem>>) attributes {dimension_semantics = [#tpu.dimension_semantics<parallel>, #tpu.dimension_semantics<arbitrary>], iteration_bounds = array<i64: 1, 4>, scalar_prefetch = 0 : i64, scratch_operands = 1 : i64, tpu.core_type = #tpu.core_type<tc>, window_params = [{transform_indices = @transform_0, window_bounds = array<i64: 4>}, {transform_indices = @transform_1, window_bounds = array<i64: 4>}, {transform_indices = @transform_2, window_bounds = array<i64: 2, 8>}, {transform_indices = @transform_3, window_bounds = array<i64: 1, 2, 8, 32>}, {pipeline_mode = #tpu.pipeline_mode<synchronous>, transform_indices = @transform_4, window_bounds = array<i64: 32, 128>}, {transform_indices = @transform_5, window_bounds = array<i64: 2, 8, 128>}, {transform_indices = @transform_6, window_bounds = array<i64: 2, 8, 8>}]} {
    %c0 = arith.constant 0 : index
    %c0_0 = arith.constant 0 : index
    %c0_1 = arith.constant 0 : index
    %c0_2 = arith.constant 0 : index
    %0 = vector.load %arg5[%c0, %c0_0, %c0_1, %c0_2] : memref<1x2x8x32xbf16, #tpu.memory_space<vmem>>, vector<1x2x8x32xbf16>
    %1 = vector.shape_cast %0 : vector<1x2x8x32xbf16> to vector<2x8x32xbf16>
    %2 = vector.shape_cast %1 : vector<2x8x32xbf16> to vector<16x32xbf16>
    %c0_3 = arith.constant 0 : index
    %c0_4 = arith.constant 0 : index
    %3 = vector.load %arg6[%c0_3, %c0_4] : memref<32x128xbf16, #tpu.memory_space<vmem>>, vector<32x128xbf16>
    %cst = arith.constant dense<0.000000e+00> : vector<16x128xf32>
    %4 = tpu.matmul %2, %3, %cst {dimension_numbers = #tpu.dot_dimension_numbers<[1], [0], [0], [1], [0, 0, 1, 1], [], []>} : vector<16x32xbf16>, vector<32x128xbf16>, vector<16x128xf32> -> vector<16x128xf32>
    %5 = vector.shape_cast %4 : vector<16x128xf32> to vector<2x8x128xf32>
    %6 = tpu.iota {dimensions = array<i32: 2>} : vector<1x1x128xi32>
    %7 = arith.index_cast %arg1 : i32 to index
    %8 = memref.load %arg2[%7] : memref<4xf32, #tpu.memory_space<smem>>
    %9 = arith.index_cast %arg1 : i32 to index
    %10 = memref.load %arg3[%9] : memref<4xf32, #tpu.memory_space<smem>>
    %c16_i32 = arith.constant 16 : i32
    %11 = vector.broadcast %c16_i32 : i32 to vector<1x1x128xi32>
    %12 = arith.cmpi slt, %6, %11 : vector<1x1x128xi32>
    %c24_i32 = arith.constant 24 : i32
    %13 = vector.broadcast %c24_i32 : i32 to vector<1x1x128xi32>
    %14 = arith.cmpi slt, %6, %13 : vector<1x1x128xi32>
    %cst_5 = arith.constant 0.000000e+00 : f32
    %15 = vector.broadcast %10 : f32 to vector<1x1x128xf32>
    %16 = vector.broadcast %cst_5 : f32 to vector<1x1x128xf32>
    %17 = arith.select %14, %15, %16 : vector<1x1x128xi1>, vector<1x1x128xf32>
    %18 = vector.broadcast %8 : f32 to vector<1x1x128xf32>
    %19 = arith.select %12, %18, %17 : vector<1x1x128xi1>, vector<1x1x128xf32>
    %c0_i32 = arith.constant 0 : i32
    %20 = arith.cmpi eq, %arg1, %c0_i32 : i32
    %21 = arith.extui %20 : i1 to i32
    %c0_i32_6 = arith.constant 0 : i32
    %22 = arith.cmpi ne, %21, %c0_i32_6 : i32
    scf.if %22 {
      %29 = vector.broadcast %19 : vector<1x1x128xf32> to vector<2x8x128xf32>
      %30 = arith.mulf %5, %29 : vector<2x8x128xf32>
      %c0_10 = arith.constant 0 : index
      %c0_11 = arith.constant 0 : index
      %c0_12 = arith.constant 0 : index
      %31 = vector.load %arg9[%c0_10, %c0_11, %c0_12] : memref<2x8x128xf32, #tpu.memory_space<vmem>>, vector<2x8x128xf32>
      tpu.vector_store %arg9[%c0_10, %c0_11, %c0_12], %30 {strides = array<i32>} : memref<2x8x128xf32, #tpu.memory_space<vmem>>, vector<2x8x128xf32>,
    } else {
    }
    %c0_i32_7 = arith.constant 0 : i32
    %23 = arith.cmpi sgt, %arg1, %c0_i32_7 : i32
    %24 = arith.extui %23 : i1 to i32
    %c0_i32_8 = arith.constant 0 : i32
    %25 = arith.cmpi ne, %24, %c0_i32_8 : i32
    scf.if %25 {
      %c0_10 = arith.constant 0 : index
      %c0_11 = arith.constant 0 : index
      %c0_12 = arith.constant 0 : index
      %29 = vector.load %arg9[%c0_10, %c0_11, %c0_12] : memref<2x8x128xf32, #tpu.memory_space<vmem>>, vector<2x8x128xf32>
      %30 = vector.broadcast %19 : vector<1x1x128xf32> to vector<2x8x128xf32>
      %31 = arith.mulf %5, %30 : vector<2x8x128xf32>
      %32 = arith.addf %29, %31 : vector<2x8x128xf32>
      %c0_13 = arith.constant 0 : index
      %c0_14 = arith.constant 0 : index
      %c0_15 = arith.constant 0 : index
      %33 = vector.load %arg9[%c0_13, %c0_14, %c0_15] : memref<2x8x128xf32, #tpu.memory_space<vmem>>, vector<2x8x128xf32>
      tpu.vector_store %arg9[%c0_13, %c0_14, %c0_15], %32 {strides = array<i32>} : memref<2x8x128xf32, #tpu.memory_space<vmem>>, vector<2x8x128xf32>,
    } else {
    }
    %c3_i32 = arith.constant 3 : i32
    %26 = arith.cmpi eq, %arg1, %c3_i32 : i32
    %27 = arith.extui %26 : i1 to i32
    %c0_i32_9 = arith.constant 0 : i32
    %28 = arith.cmpi ne, %27, %c0_i32_9 : i32
    scf.if %28 {
      %c0_10 = arith.constant 0 : index
      %c0_11 = arith.constant 0 : index
      %c0_12 = arith.constant 0 : index
      %29 = vector.load %arg9[%c0_10, %c0_11, %c0_12] : memref<2x8x128xf32, #tpu.memory_space<vmem>>, vector<2x8x128xf32>
      %c16_i32_13 = arith.constant 16 : i32
      %30 = vector.broadcast %c16_i32_13 : i32 to vector<1x1x128xi32>
      %31 = arith.cmpi slt, %6, %30 : vector<1x1x128xi32>
      %cst_14 = arith.constant 0.000000e+00 : f32
      %32 = vector.shape_cast %31 : vector<1x1x128xi1> to vector<1x1x128xi1>
      %33 = vector.broadcast %32 : vector<1x1x128xi1> to vector<2x8x128xi1>
      %34 = vector.broadcast %cst_14 : f32 to vector<2x8x128xf32>
      %35 = arith.select %33, %29, %34 : vector<2x8x128xi1>, vector<2x8x128xf32>
      %36 = arith.mulf %35, %35 : vector<2x8x128xf32>
      %cst_15 = arith.constant dense<0.000000e+00> : vector<2x8xf32>
      %37 = vector.multi_reduction <add>, %36, %cst_15 [2] : vector<2x8x128xf32> to vector<2x8xf32>
      %cst_16 = arith.constant dense<0.000000e+00> : vector<2x8x8xf32>
      %38 = tpu.matmul %35, %35, %cst_16 {dimension_numbers = #tpu.dot_dimension_numbers<[2], [2], [1], [1], [0, 0, 0, 1, 1, 1], [0], [0]>} : vector<2x8x128xf32>, vector<2x8x128xf32>, vector<2x8x8xf32> -> vector<2x8x8xf32>
      %39 = vector.shape_cast %37 : vector<2x8xf32> to vector<2x8x1xf32>
      %40 = vector.shape_cast %37 : vector<2x8xf32> to vector<2x1x8xf32>
      %41 = vector.broadcast %39 : vector<2x8x1xf32> to vector<2x8x8xf32>
      %42 = vector.broadcast %40 : vector<2x1x8xf32> to vector<2x8x8xf32>
      %43 = arith.addf %41, %42 : vector<2x8x8xf32>
      %cst_17 = arith.constant 2.000000e+00 : f32
      %44 = vector.broadcast %cst_17 : f32 to vector<2x8x8xf32>
      %45 = arith.mulf %44, %38 : vector<2x8x8xf32>
      %46 = arith.subf %43, %45 : vector<2x8x8xf32>
      %cst_18 = arith.constant 0.000000e+00 : f32
      %47 = vector.broadcast %cst_18 : f32 to vector<2x8x8xf32>
      %48 = arith.maximumf %46, %47 : vector<2x8x8xf32>
      %c0_19 = arith.constant 0 : index
      %c0_20 = arith.constant 0 : index
      %c0_21 = arith.constant 0 : index
      %49 = vector.load %arg8[%c0_19, %c0_20, %c0_21] : memref<2x8x8xf32, #tpu.memory_space<vmem>>, vector<2x8x8xf32>
      tpu.vector_store %arg8[%c0_19, %c0_20, %c0_21], %48 {strides = array<i32>} : memref<2x8x8xf32, #tpu.memory_space<vmem>>, vector<2x8x8xf32>,
      %c16_i32_22 = arith.constant 16 : i32
      %50 = vector.broadcast %c16_i32_22 : i32 to vector<1x1x128xi32>
      %51 = arith.cmpi sge, %6, %50 : vector<1x1x128xi32>
      %c24_i32_23 = arith.constant 24 : i32
      %52 = vector.broadcast %c24_i32_23 : i32 to vector<1x1x128xi32>
      %53 = arith.cmpi slt, %6, %52 : vector<1x1x128xi32>
      %54 = arith.andi %51, %53 : vector<1x1x128xi1>
      %c0_24 = arith.constant 0 : index
      %c0_25 = arith.constant 0 : index
      %55 = vector.load %arg4[%c0_24, %c0_25] : memref<2x8xf32, #tpu.memory_space<vmem>>, vector<2x8xf32>
      %56 = vector.shape_cast %55 : vector<2x8xf32> to vector<2x8x1xf32>
      %cst_26 = arith.constant 5.000000e-01 : f32
      %57 = vector.broadcast %cst_26 : f32 to vector<2x8x1xf32>
      %58 = arith.cmpf ogt, %56, %57 : vector<2x8x1xf32>
      %cst_27 = arith.constant dense<true> : vector<1x1x128xi1>
      %59 = arith.xori %54, %cst_27 : vector<1x1x128xi1>
      %60 = vector.broadcast %58 : vector<2x8x1xi1> to vector<2x8x128xi1>
      %61 = vector.broadcast %59 : vector<1x1x128xi1> to vector<2x8x128xi1>
      %62 = arith.ori %60, %61 : vector<2x8x128xi1>
      %cst_28 = arith.constant 0xFF800000 : f32
      %63 = vector.broadcast %cst_28 : f32 to vector<2x8x128xf32>
      %64 = arith.select %62, %29, %63 : vector<2x8x128xi1>, vector<2x8x128xf32>
      %c0_29 = arith.constant 0 : index
      %c0_30 = arith.constant 0 : index
      %c0_31 = arith.constant 0 : index
      %65 = vector.load %arg7[%c0_29, %c0_30, %c0_31] : memref<2x8x128xf32, #tpu.memory_space<vmem>>, vector<2x8x128xf32>
      tpu.vector_store %arg7[%c0_29, %c0_30, %c0_31], %64 {strides = array<i32>} : memref<2x8x128xf32, #tpu.memory_space<vmem>>, vector<2x8x128xf32>,
    } else {
    }
    return
  }
  func.func @transform_0(%arg0: i32, %arg1: i32) -> i32 {
    %c0_i32 = arith.constant 0 : i32
    %c0_i32_0 = arith.constant 0 : i32
    return %c0_i32 : i32
  }
  func.func @transform_1(%arg0: i32, %arg1: i32) -> i32 {
    %c0_i32 = arith.constant 0 : i32
    %c0_i32_0 = arith.constant 0 : i32
    return %c0_i32 : i32
  }
  func.func @transform_2(%arg0: i32, %arg1: i32) -> (i32, i32) {
    %c0_i32 = arith.constant 0 : i32
    %c0_i32_0 = arith.constant 0 : i32
    return %arg0, %c0_i32 : i32, i32
  }
  func.func @transform_3(%arg0: i32, %arg1: i32) -> (i32, i32, i32, i32) {
    %c0_i32 = arith.constant 0 : i32
    %c0_i32_0 = arith.constant 0 : i32
    %c0_i32_1 = arith.constant 0 : i32
    return %arg1, %arg0, %c0_i32, %c0_i32_0 : i32, i32, i32, i32
  }
  func.func @transform_4(%arg0: i32, %arg1: i32) -> (i32, i32) {
    %c0_i32 = arith.constant 0 : i32
    %c0_i32_0 = arith.constant 0 : i32
    %c0_i32_1 = arith.constant 0 : i32
    return %c0_i32, %c0_i32_0 : i32, i32
  }
  func.func @transform_5(%arg0: i32, %arg1: i32) -> (i32, i32, i32) {
    %c0_i32 = arith.constant 0 : i32
    %c0_i32_0 = arith.constant 0 : i32
    %c0_i32_1 = arith.constant 0 : i32
    return %arg0, %c0_i32, %c0_i32_0 : i32, i32, i32
  }
  func.func @transform_6(%arg0: i32, %arg1: i32) -> (i32, i32, i32) {
    %c0_i32 = arith.constant 0 : i32
    %c0_i32_0 = arith.constant 0 : i32
    %c0_i32_1 = arith.constant 0 : i32
    return %arg0, %c0_i32, %c0_i32_0 : i32, i32, i32
  }
}

</mosaic_0001>

<bundles_post_ra>
// kernel: tpu_custom_call.1
= control target key start
LH: loop header
LB: loop body
LE: loop exit
PB: predicated region body
PF: predicated region fallthrough
CT: control target
= control target key end

     0   :  { %12 = vsyncpa [#allocation6], 0  ;;  %s1544_s0 = inlined_call_operand.hbm [shape: f32[4], index: 0, kind: input, shape index: {}]   ;;  %s1545_s1 = inlined_call_operand.vmem [shape: f32[4], index: 1, kind: input, shape index: {}]   ;;  %s1546_s2 = inlined_call_operand.vmem [shape: f32[2,8], index: 2, kind: input, shape index: {}]   ;;  %s1547_s3 = inlined_call_operand.hbm [shape: bf16[4,2,8,32], index: 3, kind: input, shape index: {}]   ;;  %s1548_s4 = inlined_call_operand.hbm [shape: bf16[32,128], index: 4, kind: input, shape index: {}]   ;;  %s1549_s5 = inlined_call_operand.hbm [shape: f32[2,8,128], index: 5, kind: output, shape index: {0}]   ;;  %s1550_s6 = inlined_call_operand.hbm [shape: f32[2,8,8], index: 6, kind: output, shape index: {1}]  }
   0x1   :  { %13 = vsyncpa [#allocation7], 0 }
   0x2   :  { %14 = vsyncpa [#allocation4], 0 }
   0x3   :  { %16 = vsyncpa [#allocation4 + $0x1], 0 }
   0x4   :  { %17 = vsyncpa [#allocation11], 0 }
   0x5   :  { %18 = vsyncpa [#allocation5], 0 }
   0x6   :  { %19 = vsyncpa [#allocation14], 0  ;;  %s1255_s21 = smov 0   ;;  %s1257_s22 = smov 0  }
   0x7   :  { %s1259_s23 = smov 0   ;;  %s1261_s24 = smov 0  }
   0x8   :  { %s1263_s25 = smov 0   ;;  %s1265_s26 = smov 0  }
   0x9 LB: > { %s825_s27 = sadd.s32 4294967295, %s1203_s26   ;;  %p127_p0 = scmp.ne.s32.totalorder %s1187_s22, %s1183_s21  ;;  %s1203_s26 = sphi %s1265_s26, %s25_s26   ;;  %s1199_s25 = sphi %s1263_s25, %s1566_s25   ;;  %s1195_s24 = sphi %s1261_s24, %s1565_s24   ;;  %s1191_s23 = sphi %s1259_s23, %s1564_s23   ;;  %s1187_s22 = sphi %s1257_s22, %s1563_s22   ;;  %s1183_s21 = sphi %s1255_s21, %s1562_s21  }
   0xa   : > { %p1287_p1 = scmp.eq.s32.totalorder %s825_s27, 0  ;;  %p826_p2 = scmp.ge.s32.totalorder %s1203_s26, 1 }
   0xb   : > { %p211_p3 = scmp.lt.s32.totalorder %s1203_s26, 5  ;;  %s233_s9 = sshll.u32 %s1545_s1, 4  ;;  %s234_s9 = int_to_ptr.vmem [resolvable:$true] %s233_s9 }
   0xc   : > { %s1554_s28 = scalar_select %p1287_p1, 1, 0 }
   0xd   : > { %p1295_p4 = por %p1287_p1, %p127_p0  ;;  %p1299_p5 = pnand %p826_p2, %p211_p3 }
   0xe   : > { %s1205_s11 = smov [#allocation10]   ;;  %s995_s15 = scalar_lea.hbm %s1544_s0, 16 }
   0xf   : > { %s1555_s29 = scalar_select %p1295_p4, 1, 0 }
  0x10   : > { %p905_p6 = pneg %p1299_p5  ;;  %s250_s12 = sshll.u32 %s1205_s11, 4  ;;  %s1314_s12 = int_to_ptr.vmem [resolvable:$true] %s250_s12 }
  0x11   : > { %p996_p8 = scmp.ne.s32.totalorder %s1544_s0, %s995_s15  ;;  %p1002_p12 = scmp.lt.u32.totalorder %s995_s15, %s1544_s0 }
  0x12   : > { %p1310_p7 = pnand %p905_p6, %p1287_p1 }
  0x14   : > { %p997_p9 = pneg %p1310_p7 }
  0x16   : > { %p998_p10 = pnand %p997_p9, %p996_p8 }
  0x18   : > { %p999_p11 = pneg %p998_p10 }
  0x1a   : > { %p1004_p13 = pnand %p1002_p12, %p999_p11 }
  0x1c   : > { %1007 = shalt.err (!%p1004_p13)
}
  0x1d   : > { %s1206_s20 = smov [#allocation3]   ;;  %s1008_s8 = scalar_lea.vmem %s234_s9, 16 }
  0x1e   : > { %908 = dma.hbm_to_smem (!%p1310_p7), %s1544_s0, 16, %s1206_s20, [#allocation6]  }
  0x1f   : > { %p1009_p0 = scmp.ne.s32.totalorder %s234_s9, %s1008_s8  ;;  %p1016_p6 = scmp.lt.s32.totalorder %s234_s9, %s234_s9 }
  0x20   : > { %p1017_p8 = scmp.lt.s32.totalorder %s1008_s8, %s1008_s8 }
  0x21   : > { %p1011_p2 = pnand %p1009_p0, %p997_p9 }
  0x22   : > { %p1018_p10 = por %p1017_p8, %p1016_p6 }
  0x23   : > { %p1012_p3 = pneg %p1011_p2 }
  0x25   : > { %p1019_p4 = pnand %p1018_p10, %p1012_p3 }
  0x27   : > { %1022 = shalt.err (!%p1019_p4)
}
  0x28   : > { %s1207_s11 = smov [#allocation8]   ;;  %s1023_s15 = scalar_lea.hbm %s1548_s4, 256 }
  0x29   : > { %911 = dma.vmem_to_smem (!%p1310_p7), %s234_s9, 16, %s1207_s11, [#allocation7]  }
  0x2a   : > { %p1024_p11 = scmp.ne.s32.totalorder %s1548_s4, %s1023_s15  ;;  %p1030_p4 = scmp.lt.u32.totalorder %s1023_s15, %s1548_s4 }
  0x2c   : > { %p1026_p12 = pnand %p1024_p11, %p997_p9 }
  0x2e   : > { %p1027_p13 = pneg %p1026_p12 }
  0x30   : > { %p1032_p0 = pnand %p1030_p4, %p1027_p13 }
  0x32   : > { %1035 = shalt.err (!%p1032_p0)
}
  0x33   : > { %s1036_s9 = scalar_lea.vmem %s1314_s12, 256  ;;  %p1044_p8 = scmp.lt.s32.totalorder %s1314_s12, %s1314_s12 }
  0x34   : > { %p1037_p2 = scmp.ne.s32.totalorder %s1314_s12, %s1036_s9  ;;  %p1045_p10 = scmp.lt.s32.totalorder %s1036_s9, %s1036_s9 }
  0x36   : > { %p1039_p3 = pnand %p1037_p2, %p997_p9  ;;  %p1046_p11 = por %p1045_p10, %p1044_p8 }
  0x38   : > { %p1040_p6 = pneg %p1039_p3 }
  0x3a   : > { %p1047_p12 = pnand %p1046_p11, %p1040_p6 }
  0x3c   : > { %1050 = shalt.err (!%p1047_p12)
}
  0x3d   : > { %s1208_s20 = smov 64   ;;  %s1209_s21 = smov 4  }
  0x3e   : > { %914 = dma.hbm_to_vmem [thread:$0]  (!%p1310_p7), %s1548_s4, 256, %s1314_s12, [#allocation11], %s1208_s20, %s1208_s20, %s1209_s21  }
  0x3f   : > { %s34_s11 = sadd.s32 1, %s1199_s25  ;;  %p121_p9 = scmp.ne.s32.totalorder %s1191_s23, %s1187_s22 }
  0x40   : > { %p35_p13 = scmp.ge.s32.totalorder %s34_s11, 4  ;;  %p122_p4 = scmp.eq.s32.totalorder %s1203_s26, 0 }
  0x41   : > { %s114_s13 = sadd.s32 1, %s1191_s23  ;;  %s264_s14 = sand.u32 1, %s1191_s23  }
  0x42   : > { %s1568_s11 = smov (%p35_p13, %s34_s11), 0  ;;  %p123_p0 = por %p122_p4, %p121_p9 }
  0x43   : > { %p922_p2 = scmp.lt.s32.totalorder %s1203_s26, 4  ;;  %s109_s10 = ssub.s32 %s1199_s25, %s1568_s11 }
  0x44   : > { %s832_s15 = sshll.u32 %s264_s14, 3  ;;  %p112_p3 = scmp.eq.s32.totalorder %s109_s10, 0 }
  0x45   : > { %s857_s16 = sshll.u32 %s1199_s25, 7  ;;  %s268_s17 = scalar_lea.vmem [#allocation9], %s832_s15 }
  0x46   : > { %s277_s18 = sshll.u32 %s268_s17, 4  ;;  %s1386_s7 = scalar_lea.hbm %s1547_s3, %s857_s16  ;;  %s1388_s18 = int_to_ptr.vmem [resolvable:$true] %s277_s18 }
  0x47   : > { %s1381_s19 = scalar_select %p112_p3, %s1191_s23, %s114_s13  }
  0x48   : > { %p1390_p7 = pnand %p922_p2, %p123_p0  ;;  %s1394_s10 = scalar_lea.sflag [#allocation4], %s264_s14 }
  0x49   : > { %s1051_s13 = scalar_lea.hbm %s1386_s7, 128  ;;  %s1056_s17 = scalar_lea.hbm %s1547_s3, 512 }
  0x4a   : > { %p1052_p6 = scmp.ne.s32.totalorder %s1386_s7, %s1051_s13  ;;  %p1053_p8 = pneg %p1390_p7 }
  0x4b   : > { %p1057_p12 = scmp.lt.u32.totalorder %s1386_s7, %s1547_s3  ;;  %p1058_p9 = scmp.lt.u32.totalorder %s1056_s17, %s1051_s13 }
  0x4c   : > { %p1054_p10 = pnand %p1053_p8, %p1052_p6  ;;  %p1060_p4 = scmp.lt.u32.totalorder %s1051_s13, %s1386_s7 }
  0x4d   : > { %p1059_p13 = por %p1058_p9, %p1057_p12 }
  0x4e   : > { %p1055_p11 = pneg %p1054_p10 }
  0x4f   : > { %p1061_p0 = por %p1060_p4, %p1059_p13 }
  0x51   : > { %p1062_p2 = pnand %p1061_p0, %p1055_p11 }
  0x53   : > { %1065 = shalt.err (!%p1062_p2)
}
  0x54   : > { %s1066_s14 = scalar_lea.vmem %s1388_s18, 128  ;;  %s1210_s15 = smov [#allocation9]  }
  0x55   : > { %p1067_p3 = scmp.ne.s32.totalorder %s1388_s18, %s1066_s14  ;;  %s1071_s16 = sshll.u32 %s1210_s15, 4  ;;  %s1072_s16 = int_to_ptr.vmem [resolvable:$false] %s1071_s16 }
  0x56   : > { %s1073_s12 = scalar_lea.vmem %s1072_s16, 256  ;;  %p1074_p1 = scmp.lt.s32.totalorder %s1388_s18, %s1072_s16 }
  0x57   : > { %p1069_p6 = pnand %p1067_p3, %p1053_p8  ;;  %p1075_p12 = scmp.lt.s32.totalorder %s1073_s12, %s1066_s14 }
  0x59   : > { %p1070_p10 = pneg %p1069_p6  ;;  %p1076_p9 = por %p1075_p12, %p1074_p1 }
  0x5b   : > { %p1077_p13 = pnand %p1076_p9, %p1070_p10 }
  0x5d   : > { %1080 = shalt.err (!%p1077_p13)
}
  0x5e   : > { %918 = dma.hbm_to_vmem [thread:$0]  (!%p1390_p7), %s1386_s7, 128, %s1388_s18, %s1394_s10, %s1208_s20, %s1208_s20, %s1209_s21  }
  0x5f   : > { %289 = sbr.rel (%p1299_p5) target bundleno = 630 (0x276), region = 40  ;;  %p1559_p8 = scmp.ne.s32.totalorder (!%p1299_p5), %s1554_s28, 0 }
  0x66   : > { %1158 = dma.done.wait (%p1559_p8), [#allocation6], 16  }
  0x67   : > { %1160 = vsyncadd (%p1559_p8), [#allocation6], 4294967280 }
  0x68   : > { %1162 = dma.done.wait (%p1559_p8), [#allocation7], 16  }
  0x69   : > { %1164 = vsyncadd (%p1559_p8), [#allocation7], 4294967280  ;;  %s299_s8 = sand.u32 1, %s1187_s22   ;;  %p1560_p1 = scmp.ne.s32.totalorder %s1555_s29, 0 }
  0x6a   : > { %s838_s13 = sshll.u32 %s299_s8, 3  ;;  %s300_s20 = scalar_lea.sflag [#allocation4], %s299_s8 }
  0x6b   : > { %s303_s21 = scalar_lea.vmem [#allocation9], %s838_s13 }
  0x6c   : > { %1166 = dma.done.wait (%p1560_p1), %s300_s20, 128  }
  0x6d   : > { %1168 = vsyncadd (%p1560_p1), %s300_s20, 4294967168 }
  0x6e   : > { %1170 = dma.done.wait (%p1559_p8), [#allocation11], 256  }
  0x6f   : > { %1172 = vsyncadd (%p1559_p8), [#allocation11], 4294967040 }
  0x70   : > { %312 = sfence }
  0x71   : > { %v992_v0 = vld [vmem:[#allocation10] sm:$0xff]   ;;  %v1211_v1 = vmov 0.0   ;;  %v993_v2 = vld [vmem:[#allocation10 + $0x8] sm:$0xff]   ;;  %vm1212_vm0 = vmmov 0   ;;  %v994_v3 = vld [vmem:[%s303_s21] sm:$0xff]   ;;  %vm367_vm1 = vcmask 261120   ;;  %v412_v4 = vlaneseq }
  0x72   : > { %865 = vmatprep.subr.bf16.mxu0 %v1211_v1  ;;  %869 = vmatprep.mubr.msk.bf16.mxu0 %vm1212_vm0, %v1211_v1  ;;  %s415_s29 = sld [smem:[#allocation8 + %s1195_s24]]  ;;  %p844_p5 = scmp.ne.s32.totalorder %s1195_s24, 0 }
  0x73   : > { %866 = vmatpush3.bf16.msra.mxu0 %v992_v0  ;;  %s414_s30 = sld [smem:[#allocation3 + %s1195_s24]]  ;;  %v1446_v5 = vand.u32 127, %v412_v4 }
  0x74   : > { %867 = vmatprep.subr.bf16.mxu0 %v1211_v1 }
  0x75   : > { %vm417_vm2 = vcmp.lt.s32.totalorder %v1446_v5, 24  ;;  %vm416_vm3 = vcmp.lt.s32.totalorder %v1446_v5, 16 }
  0x77   : > { %868 = vmatpush3.bf16.msra.mxu0 %v993_v2 }
  0x78   : > { %v418_v6 = vstv %s415_s29 }
  0x79   : > { %v419_v7 = vsel %vm417_vm2, %v418_v6, 0.0  ;;  %v420_v8 = vstv %s414_s30 }
  0x7a   : > { %870 = vmatmul.mubr.msk.bf16.vlgmr.msra.gmra.mrb[0].mxu0 %vm367_vm1, %v994_v3  ;;  %v421_v9 = vsel %vm416_vm3, %v420_v8, %v419_v7 }
 0x14a   : > { %425 = sbr.rel (%p844_p5) target bundleno = 339 (0x153), region = 60 }
 0x14d   : > { %v405_v10 = vpop.f32.mrb[0].mxu0 }
 0x14e   : > { %v871_v11 = vpop.f32.mrb[1].mxu0  ;;  %v426_v14 = vmul.f32 (!%p844_p5), %v421_v9, %v405_v10 }
 0x14f   : > { %v408_v12 = vpop.f32.mrb[2].mxu0 }
 0x150   : > { %v872_v13 = vpop.f32.mrb[3].mxu0  ;;  %v427_v15 = vmul.f32 (!%p844_p5), %v421_v9, %v408_v12  ;;  %428 = vst [vmem:[#allocation2] sm:$0xff] (!%p844_p5), %v426_v14 }
 0x152   : > { %429 = vst [vmem:[#allocation2 + $0x8] sm:$0xff] %v427_v15 }
 0x153 PF: > { %p845_p7 = scmp.le.s32.totalorder %s1195_s24, 0 }
 0x154   : > { %v436_v17 = vmul.f32 (!%p845_p7), %v421_v9, %v405_v10  ;;  %v437_v19 = vmul.f32 (!%p845_p7), %v421_v9, %v408_v12 }
 0x155   : > { %433 = sbr.rel (%p845_p7) target bundleno = 349 (0x15d), region = 64 }
 0x159   : > { %v434_v16 = vld [vmem:[#allocation2] sm:$0xff] (!%p845_p7)  ;;  %v435_v18 = vld [vmem:[#allocation2 + $0x8] sm:$0xff] (!%p845_p7) }
 0x15a   : > { %v438_v20 = vadd.f32 (!%p845_p7), %v436_v17, %v434_v16  ;;  %v439_v21 = vadd.f32 (!%p845_p7), %v437_v19, %v435_v18 }
 0x15c   : > { %440 = vst [vmem:[#allocation2] sm:$0xff] %v438_v20  ;;  %441 = vst [vmem:[#allocation2 + $0x8] sm:$0xff] %v439_v21 }
 0x15d PF: > { %p846_p11 = scmp.ne.s32.totalorder %s1195_s24, 3 }
 0x15e   : > { %v601_v24 = vshrl.u32 (!%p846_p11), %v412_v4, 7  ;;  %v1213_v25 = vmov (!%p846_p11), 0.0   ;;  %v641_v28 = vld [vmem:[%s1546_s2] sm:$0x3] (!%p846_p11)  ;;  %vm1214_vm4 = vmmov (!%p846_p11), 0   ;;  %vm639_vm5 = vcmp.ge.s32.totalorder (!%p846_p11), %v1446_v5, 16 }
 0x15f   : > { %445 = sbr.rel (%p846_p11) target bundleno = 579 (0x243), region = 68  ;;  %873 = vmatprep.subr.mxu0 (!%p846_p11), %v1213_v25  ;;  %878 = vmatprep.subr.mxu1 (!%p846_p11), %v1213_v25  ;;  %vm640_vm6 = vmand (!%p846_p11), %vm639_vm5, %vm417_vm2  ;;  %vm1215_vm7 = vmmov (!%p846_p11), 1   ;;  %vm636_vm13 = vcmask (!%p846_p11), 64512  }
 0x160   : > { %v644_v30 = vsub.s32 (!%p846_p11), 0, %v601_v24  ;;  %v651_v31 = vsub.s32 (!%p846_p11), 1, %v601_v24  ;;  %875 = vmatprep.mubr.msk.f32.mxu0 (!%p846_p11), %vm1214_vm4, %v1213_v25  ;;  %880 = vmatprep.mubr.msk.f32.mxu1 (!%p846_p11), %vm1214_vm4, %v1213_v25  ;;  %vm658_vm8 = vmxor (!%p846_p11), %vm640_vm6, %vm1215_vm7  ;;  %v602_v40 = vsub.s32 (!%p846_p11), %v1446_v5, %v601_v24 }
 0x162   : > { %v645_v33 = vrot.slane (!%p846_p11), %v641_v28, %v644_v30  ;;  %v652_v34 = vrot.slane (!%p846_p11), %v641_v28, %v651_v31 }
 0x163   : > { %v446_v22 = vld [vmem:[#allocation2] sm:$0xff] (!%p846_p11)  ;;  %v447_v23 = vld [vmem:[#allocation2 + $0x8] sm:$0xff] (!%p846_p11) }
 0x164   : > { %v450_v26 = vsel (!%p846_p11), %vm416_vm3, %v446_v22, 0.0  ;;  %v451_v27 = vsel (!%p846_p11), %vm416_vm3, %v447_v23, 0.0  ;;  %874 = vmatpush3.xpose.msk.msra.mxu0 (!%p846_p11), %vm416_vm3, %v446_v22  ;;  %879 = vmatpush3.xpose.msk.msra.mxu1 (!%p846_p11), %vm416_vm3, %v447_v23 }
 0x165   : > { %v452_v29 = vmul.f32 (!%p846_p11), %v450_v26, %v450_v26  ;;  %v453_v32 = vmul.f32 (!%p846_p11), %v451_v27, %v451_v27  ;;  %647 = vbcast.lane.b32.xlu1 (!%p846_p11), %v645_v33, 256 }
 0x167   : > { %454 = vadd.xlane.f32.xlu0 %v452_v29  ;;  %876 = vmatmul.mubr.msk.f32.vlgmr.msra.gmra.mrb[0].mxu0 %vm416_vm3, %v446_v22 }
 0x168   : > { %881 = vmatmul.mubr.msk.f32.vlgmr.msra.gmra.mrb[0].mxu1 %vm416_vm3, %v447_v23 }
 0x169   : > { %654 = vbcast.lane.b32.xlu1 %v652_v34, 256 }
 0x16b   : > { %456 = vadd.xlane.f32.xlu0 %v453_v32 }
 0x1d7   : > { %v648_v35 = vpop.permute.xlu1 %647 }
 0x1d8   : > { %vm656_vm9 = vcmp.gt.f32.partialorder %v648_v35, 0.5 }
 0x1d9   : > { %vm665_vm10 = vmor %vm656_vm9, %vm658_vm8 }
 0x1da   : > { %v667_v36 = vsel %vm665_vm10, %v446_v22, -inf }
 0x1db   : > { %669 = vst [vmem:[#allocation12] sm:$0xff] %v667_v36  ;;  %v655_v37 = vpop.permute.xlu1 %654 }
 0x1dc   : > { %vm657_vm11 = vcmp.gt.f32.partialorder %v655_v37, 0.5 }
 0x1dd   : > { %vm666_vm12 = vmor %vm657_vm11, %vm658_vm8 }
 0x1de   : > { %v668_v38 = vsel %vm666_vm12, %v447_v23, -inf }
 0x1df   : > { %670 = vst [vmem:[#allocation12 + $0x8] sm:$0xff] %v668_v38 }
 0x1f4   : > { %v455_v39 = vpop.xlane.xlu0 %454 }
 0x1f5   : > { %v603_v42 = vrot.slane %v455_v39, %v602_v40 }
 0x1f7   : > { %v628_v46 = vadd.f32 %v603_v42, %v455_v39 }
 0x1f8   : > { %v457_v41 = vpop.xlane.xlu0 %456 }
 0x1f9   : > { %v607_v43 = vrot.slane %v457_v41, %v602_v40 }
 0x1fb   : > { %v629_v47 = vadd.f32 %v607_v43, %v457_v41 }
 0x23a   : > { %v524_v44 = vpop.f32.mrb[0].mxu0 }
 0x23b   : > { %v594_v45 = vpop.f32.mrb[0].mxu1  ;;  %v630_v48 = vmul.f32 2.0, %v524_v44  ;;  %v877_v50 = vpop.f32.mrb[1].mxu0 }
 0x23c   : > { %v631_v49 = vmul.f32 2.0, %v594_v45  ;;  %v882_v51 = vpop.f32.mrb[1].mxu1 }
 0x23d   : > { %v632_v52 = vsub.f32 %v628_v46, %v630_v48 }
 0x23e   : > { %v633_v53 = vsub.f32 %v629_v47, %v631_v49 }
 0x23f   : > { %v634_v54 = vmax.f32 %v632_v52, 0.0 }
 0x240   : > { %v635_v55 = vmax.f32 %v633_v53, 0.0 }
 0x241   : > { %637 = vst.msk [vmem:[#allocation13] sm:$0xff] %vm636_vm13, %v634_v54 }
 0x242   : > { %638 = vst.msk [vmem:[#allocation13 + $0x8] sm:$0xff] %vm636_vm13, %v635_v55 }
 0x243 PF: > { %p1478_p4 = scmp.eq.s32.totalorder %s825_s27, 3  ;;  %s1216_s7 = smov [#allocation12]  }
 0x244   : > { %s680_s10 = sshll.u32 %s1216_s7, 4  ;;  %s681_s10 = int_to_ptr.vmem [resolvable:$true] %s680_s10 }
 0x245   : > { %s1081_s17 = scalar_lea.vmem %s681_s10, 256  ;;  %p1088_p6 = scmp.lt.s32.totalorder %s681_s10, %s681_s10 }
 0x246   : > { %p1082_p0 = scmp.ne.s32.totalorder %s681_s10, %s1081_s17  ;;  %p1089_p10 = scmp.lt.s32.totalorder %s1081_s17, %s1081_s17 }
 0x248   : > { %p1083_p2 = pnand %p1082_p0, %p1478_p4  ;;  %p1090_p12 = por %p1089_p10, %p1088_p6 }
 0x24a   : > { %p1084_p3 = pneg %p1083_p2 }
 0x24c   : > { %p1091_p9 = pnand %p1090_p12, %p1084_p3 }
 0x24e   : > { %1094 = shalt.err (!%p1091_p9)
}
 0x24f   : > { %s1095_s27 = scalar_lea.hbm %s1549_s5, 256 }
 0x250   : > { %p1096_p13 = scmp.ne.s32.totalorder %s1549_s5, %s1095_s27  ;;  %p1101_p5 = scmp.lt.u32.totalorder %s1095_s27, %s1549_s5 }
 0x252   : > { %p1097_p8 = pnand %p1096_p13, %p1478_p4 }
 0x254   : > { %p1098_p1 = pneg %p1097_p8 }
 0x256   : > { %p1103_p7 = pnand %p1101_p5, %p1098_p1 }
 0x258   : > { %1106 = shalt.err (!%p1103_p7)
}
 0x259   : > { %s1217_s13 = smov 128   ;;  %s1218_s20 = smov 8  }
 0x25a   : > { %898 = dma.vmem_to_hbm [thread:$0]  (%p1478_p4), %s681_s10, 256, %s1549_s5, [#allocation5], %s1217_s13, %s1217_s13, %s1218_s20  }
 0x25b   : > { %s1219_s30 = smov [#allocation13]  }
 0x25c   : > { %s696_s28 = sshll.u32 %s1219_s30, 4  ;;  %s697_s28 = int_to_ptr.vmem [resolvable:$true] %s696_s28 }
 0x25d   : > { %s1107_s18 = scalar_lea.vmem %s697_s28, 256  ;;  %p1114_p3 = scmp.lt.s32.totalorder %s697_s28, %s697_s28 }
 0x25e   : > { %p1108_p11 = scmp.ne.s32.totalorder %s697_s28, %s1107_s18  ;;  %p1115_p6 = scmp.lt.s32.totalorder %s1107_s18, %s1107_s18 }
 0x260   : > { %p1109_p0 = pnand %p1108_p11, %p1478_p4  ;;  %p1116_p10 = por %p1115_p6, %p1114_p3 }
 0x262   : > { %p1110_p2 = pneg %p1109_p0 }
 0x264   : > { %p1117_p12 = pnand %p1116_p10, %p1110_p2 }
 0x266   : > { %1120 = shalt.err (!%p1117_p12)
}
 0x267   : > { %s1121_s9 = scalar_lea.hbm %s1550_s6, 256 }
 0x268   : > { %p1122_p9 = scmp.ne.s32.totalorder %s1550_s6, %s1121_s9  ;;  %p1127_p1 = scmp.lt.u32.totalorder %s1121_s9, %s1550_s6 }
 0x26a   : > { %p1123_p13 = pnand %p1122_p9, %p1478_p4 }
 0x26c   : > { %p1124_p8 = pneg %p1123_p13 }
 0x26e   : > { %p1129_p5 = pnand %p1127_p1, %p1124_p8 }
 0x270   : > { %1132 = shalt.err (!%p1129_p5)
}
 0x271   : > { %900 = dma.vmem_to_hbm [thread:$0]  (%p1478_p4), %s697_s28, 256, %s1550_s6, [#allocation14], %s1217_s13, %s1217_s13, %s1218_s20  }
 0x272   : > { %1174 = dma.done.wait (%p1478_p4), [#allocation5], 256  }
 0x273   : > { %1176 = vsyncadd (%p1478_p4), [#allocation5], 4294967040 }
 0x274   : > { %1178 = dma.done.wait (%p1478_p4), [#allocation14], 256  }
 0x275   : > { %1180 = vsyncadd (%p1478_p4), [#allocation14], 4294967040 }
 0x276 PF: > { %s25_s26 = sadd.s32 1, %s1203_s26   ;;  %s1562_s21 = smov %s1187_s22 }
 0x277   : > { %p22_p7 = scmp.ge.s32.totalorder %s25_s26, 6   ;;  %s1563_s22 = smov %s1191_s23 }
 0x278   : > { %s1564_s23 = smov %s1381_s19  ;;  %s1565_s24 = smov %s1199_s25 }
 0x279   : > { %s1566_s25 = smov %s1568_s11  ;;  %24 = sbr.rel (!%p22_p7) target bundleno = 9 (0x9), region = 116 }
 0x280   :  { %716 = vsyncpa [#allocation4], 1 }
 0x281   :  { %718 = vsyncpa [#allocation4 + $0x1], 1 }
 0x282   :  { %719 = vsyncpa [#allocation11], 1 }
 0x283   :  { %720 = vsyncpa [#allocation5], 1 }
 0x284   :  { %722 = vsyncpa [#allocation5 + $0x1], 1 }
 0x285   :  { %723 = vsyncpa [#allocation14], 1 }
 0x286   :  { %724 = vsyncpa [#allocation6], 1 }
 0x287   :  { %726 = vsyncpa [#allocation6 + $0x1], 1 }
 0x288   :  { %727 = vsyncpa [#allocation7], 1 }
 0x289   :  { %729 = vsyncpa [#allocation7 + $0x1], 1 }

</bundles_post_ra>
